<compile_context>
chip_gen: v6e
topology: v6e:2x2x1
jax: 0.10.0
libtpu: 0.0.40
codegen_flags: <defaults>
</compile_context>

<pallas_src>
import functools

import jax
import jax.numpy as jnp
from jax.experimental import pallas as pl
from jax.experimental.pallas import tpu as pltpu


def _round_up(n, a):
    return ((n + a - 1) // a) * a


def context_encoder_kernel(x_ref, params_ref, out_ref, *,
                           num_sents, s_pad, seq_len, embed_dim, hidden_dim, off):
    """Fused ContextEncoder forward.

    x_ref      : (seq_len * s_pad, D) timestep-major flattened, zero-padded input
                 (row t*s_pad + s is timestep t of sentence s; rows s >= num_sents are pad)
    params_ref : (96, H) packed parameter slab, 8-row-aligned sections:
                 [swih (D rows) | swhh (H) | sb (1) | cwih (H) | cwhh (H) | cb (1)]
                 where s* = sentence RNN, c* = context RNN, weights pre-transposed,
                 b = b_ih + b_hh.
    out_ref    : (1, H) final context hidden state.
    """
    S, SP, T, D, H = num_sents, s_pad, seq_len, embed_dim, hidden_dim
    o_swih, o_swhh, o_sb, o_cwih, o_cwhh, o_cb = off

    # Static slices of the VMEM slab (free).
    swih = params_ref[o_swih:o_swih + D, :]                          # (D, H) f32
    swhh = params_ref[o_swhh:o_swhh + H, :].astype(jnp.bfloat16)     # (H, H) bf16 (recurrent)
    sb = params_ref[o_sb:o_sb + 1, :]                                # (1, H)
    cwih = params_ref[o_cwih:o_cwih + H, :]                          # (H, H) f32
    cwhh = params_ref[o_cwhh:o_cwhh + H, :].astype(jnp.bfloat16)     # (H, H) bf16 (recurrent)
    cb = params_ref[o_cb:o_cb + 1, :]                                # (1, H)

    # ---------------- sentence phase ----------------
    # Hoisted input projection for all sentences & timesteps: one fat f32 matmul.
    p = jnp.dot(x_ref[...], swih, preferred_element_type=jnp.float32) + sb   # (T*SP, H)

    # Batched recurrence across independent sentences; bf16 MXU operands, f32 accum/VPU.
    h = jnp.zeros((SP, H), dtype=jnp.float32)
    for t in range(T):                                   # static unroll
        p_t = p[t * SP:(t + 1) * SP, :]                  # full 8-sublane aligned tile
        h = jnp.maximum(
            p_t + jnp.dot(h.astype(jnp.bfloat16), swhh,
                          preferred_element_type=jnp.float32), 0.0)

    # ---------------- context phase ----------------
    # Row s of h is the final hidden of sentence s (padded rows never read).
    q = jnp.dot(h, cwih, preferred_element_type=jnp.float32) + cb            # (SP, H)
    hc = jnp.zeros((1, H), dtype=jnp.float32)
    for s in range(S):                                   # static unroll over real sentences
        hc = jnp.maximum(
            q[s:s + 1, :] + jnp.dot(hc.astype(jnp.bfloat16), cwhh,
                                    preferred_element_type=jnp.float32), 0.0)

    out_ref[...] = hc


def pack_params(sent_params, ctx_params):
    """One-time parameter prep (outside the jitted per-call path).

    Transposes weights, combines biases, and stacks everything into a single
    8-row-aligned (rows, H) f32 slab so the kernel takes 2 inputs instead of 7.
    Returns (slab, offsets) with offsets as static Python ints.
    """
    D = sent_params["w_ih"].shape[1]
    H = sent_params["w_hh"].shape[0]
    pieces = [
        jnp.asarray(sent_params["w_ih"], jnp.float32).T,                             # (D, H)
        jnp.asarray(sent_params["w_hh"], jnp.float32).T,                             # (H, H)
        (jnp.asarray(sent_params["b_ih"], jnp.float32)
         + jnp.asarray(sent_params["b_hh"], jnp.float32)).reshape(1, H),             # (1, H)
        jnp.asarray(ctx_params["w_ih"], jnp.float32).T,                              # (H, H)
        jnp.asarray(ctx_params["w_hh"], jnp.float32).T,                              # (H, H)
        (jnp.asarray(ctx_params["b_ih"], jnp.float32)
         + jnp.asarray(ctx_params["b_hh"], jnp.float32)).reshape(1, H),              # (1, H)
    ]
    offsets, padded, rows = [], [], 0
    for piece in pieces:
        offsets.append(rows)
        r = _round_up(piece.shape[0], 8)
        padded.append(jnp.pad(piece, ((0, r - piece.shape[0]), (0, 0))))
        rows += r
    slab = jnp.concatenate(padded, axis=0)               # (rows, H) f32
    return slab, tuple(offsets)


def make_context_encoder(sent_params, ctx_params, num_sents, seq_len):
    """Builds a jitted forward(x) -> (1, 1, H). All weight prep happens here, once."""
    D = sent_params["w_ih"].shape[1]
    H = sent_params["w_hh"].shape[0]
    S_pad = _round_up(num_sents, 8)

    slab, offsets = pack_params(sent_params, ctx_params)

    kernel = functools.partial(
        context_encoder_kernel, num_sents=num_sents, s_pad=S_pad, seq_len=seq_len,
        embed_dim=D, hidden_dim=H, off=offsets)

    flops = 2 * (seq_len * S_pad * D * H        # hoisted sentence input projection
                 + seq_len * S_pad * H * H      # sentence recurrence
                 + S_pad * H * H                # hoisted context input projection
                 + num_sents * H * H)           # context recurrence
    bytes_accessed = (seq_len * S_pad * D + slab.size + H) * 4
    cost = pl.CostEstimate(flops=flops, transcendentals=0, bytes_accessed=bytes_accessed)

    vmem = pl.BlockSpec(memory_space=pltpu.MemorySpace.VMEM)

    @jax.jit
    def forward(x):
        # (S, T, D) -> zero-pad sentences to S_pad -> timestep-major (T*S_pad, D).
        x32 = jnp.asarray(x, jnp.float32)
        x_padded = jnp.pad(x32, ((0, S_pad - num_sents), (0, 0), (0, 0)))
        x_ts = jnp.transpose(x_padded, (1, 0, 2)).reshape(seq_len * S_pad, D)
        out = pl.pallas_call(
            kernel,
            out_shape=jax.ShapeDtypeStruct((1, H), jnp.float32),
            in_specs=[vmem, vmem],
            out_specs=vmem,
            cost_estimate=cost,
        )(x_ts, slab)
        return out.reshape(1, 1, H)              # matches torch hidden (1, 1, H)

    return forward


def init_rnn_params(key, input_dim, hidden_dim):
    """Deterministic init matching PyTorch nn.RNN parameter shapes."""
    k1, k2, k3, k4 = jax.random.split(key, 4)
    bound = 1.0 / jnp.sqrt(hidden_dim)
    return {
        "w_ih": jax.random.uniform(k1, (hidden_dim, input_dim), jnp.float32, -bound, bound),
        "w_hh": jax.random.uniform(k2, (hidden_dim, hidden_dim), jnp.float32, -bound, bound),
        "b_ih": jax.random.uniform(k3, (hidden_dim,), jnp.float32, -bound, bound),
        "b_hh": jax.random.uniform(k4, (hidden_dim,), jnp.float32, -bound, bound),
    }


def context_encoder_reference(x, sent_params, ctx_params):
    """Pure-JAX f32 reference mirroring the PyTorch forward."""
    def rnn_ref(seq, p):
        h = jnp.zeros((p["w_hh"].shape[0],), jnp.float32)
        for t in range(seq.shape[0]):
            h = jnp.maximum(seq[t] @ p["w_ih"].T + p["b_ih"] + h @ p["w_hh"].T + p["b_hh"], 0.0)
        return h
    sent_h = jnp.stack([rnn_ref(x[s], sent_params) for s in range(x.shape[0])], axis=0)
    return rnn_ref(sent_h, ctx_params).reshape(1, 1, -1)


if __name__ == "__main__":
    # Small shapes consistent with the module (embed_dim -> hidden_dim RNNs).
    num_sents, seq_len, embed_dim, hidden_dim = 4, 8, 32, 16

    key = jax.random.PRNGKey(0)
    kx, ks, kc = jax.random.split(key, 3)

    # Input: a "document" of num_sents sentences, each (seq_len, embed_dim).
    x = jax.random.normal(kx, (num_sents, seq_len, embed_dim), jnp.float32)

    sent_params = init_rnn_params(ks, embed_dim, hidden_dim)   # SentenceEncoder.rnn
    ctx_params = init_rnn_params(kc, hidden_dim, hidden_dim)   # ContextEncoder.rnn

    forward = make_context_encoder(sent_params, ctx_params, num_sents, seq_len)
    out = jax.block_until_ready(forward(x))

    ref = context_encoder_reference(x, sent_params, ctx_params)
    assert out.shape == (1, 1, hidden_dim)
    # bf16 operands on the recurrent matmuls (per perf review) -> loosened tolerance
    # vs. the pure-f32 reference.
    assert jnp.allclose(out, ref, atol=3e-2, rtol=3e-2), (out, ref)

    print("KERNEL_OK")
</pallas_src>

<mosaic_0001>
module attributes {stable_mosaic.version = 11 : i64} {
  func.func @context_encoder_kernel(%arg0: memref<64x32xf32, #tpu.memory_space<vmem>>, %arg1: memref<96x16xf32, #tpu.memory_space<vmem>>, %arg2: memref<1x16xf32, #tpu.memory_space<vmem>>) attributes {dimension_semantics = [], scalar_prefetch = 0 : i64, scratch_operands = 0 : i64, tpu.core_type = #tpu.core_type<tc>} {
    %c0 = arith.constant 0 : index
    %c0_0 = arith.constant 0 : index
    %0 = vector.load %arg1[%c0, %c0_0] : memref<96x16xf32, #tpu.memory_space<vmem>>, vector<32x16xf32>
    %c32 = arith.constant 32 : index
    %c0_1 = arith.constant 0 : index
    %1 = vector.load %arg1[%c32, %c0_1] : memref<96x16xf32, #tpu.memory_space<vmem>>, vector<16x16xf32>
    %2 = arith.truncf %1 : vector<16x16xf32> to vector<16x16xbf16>
    %c48 = arith.constant 48 : index
    %c0_2 = arith.constant 0 : index
    %3 = vector.load %arg1[%c48, %c0_2] : memref<96x16xf32, #tpu.memory_space<vmem>>, vector<1x16xf32>
    %c56 = arith.constant 56 : index
    %c0_3 = arith.constant 0 : index
    %4 = vector.load %arg1[%c56, %c0_3] : memref<96x16xf32, #tpu.memory_space<vmem>>, vector<16x16xf32>
    %c72 = arith.constant 72 : index
    %c0_4 = arith.constant 0 : index
    %5 = vector.load %arg1[%c72, %c0_4] : memref<96x16xf32, #tpu.memory_space<vmem>>, vector<16x16xf32>
    %6 = arith.truncf %5 : vector<16x16xf32> to vector<16x16xbf16>
    %c88 = arith.constant 88 : index
    %c0_5 = arith.constant 0 : index
    %7 = vector.load %arg1[%c88, %c0_5] : memref<96x16xf32, #tpu.memory_space<vmem>>, vector<1x16xf32>
    %c0_6 = arith.constant 0 : index
    %c0_7 = arith.constant 0 : index
    %8 = vector.load %arg0[%c0_6, %c0_7] : memref<64x32xf32, #tpu.memory_space<vmem>>, vector<64x32xf32>
    %cst = arith.constant dense<0.000000e+00> : vector<64x16xf32>
    %9 = tpu.matmul %8, %0, %cst {dimension_numbers = #tpu.dot_dimension_numbers<[1], [0], [0], [1], [0, 0, 1, 1], [], []>} : vector<64x32xf32>, vector<32x16xf32>, vector<64x16xf32> -> vector<64x16xf32>
    %10 = vector.broadcast %3 : vector<1x16xf32> to vector<64x16xf32>
    %11 = arith.addf %9, %10 : vector<64x16xf32>
    %cst_8 = arith.constant 0.000000e+00 : f32
    %12 = vector.broadcast %cst_8 : f32 to vector<8x16xf32>
    %13 = vector.extract_strided_slice %11 {offsets = [0, 0], sizes = [8, 16], strides = [1, 1]} : vector<64x16xf32> to vector<8x16xf32>
    %14 = arith.truncf %12 : vector<8x16xf32> to vector<8x16xbf16>
    %cst_9 = arith.constant dense<0.000000e+00> : vector<8x16xf32>
    %15 = tpu.matmul %14, %2, %cst_9 {dimension_numbers = #tpu.dot_dimension_numbers<[1], [0], [0], [1], [0, 0, 1, 1], [], []>} : vector<8x16xbf16>, vector<16x16xbf16>, vector<8x16xf32> -> vector<8x16xf32>
    %16 = arith.addf %13, %15 : vector<8x16xf32>
    %cst_10 = arith.constant 0.000000e+00 : f32
    %17 = vector.broadcast %cst_10 : f32 to vector<8x16xf32>
    %18 = arith.maximumf %16, %17 : vector<8x16xf32>
    %19 = vector.extract_strided_slice %11 {offsets = [8, 0], sizes = [8, 16], strides = [1, 1]} : vector<64x16xf32> to vector<8x16xf32>
    %20 = arith.truncf %18 : vector<8x16xf32> to vector<8x16xbf16>
    %cst_11 = arith.constant dense<0.000000e+00> : vector<8x16xf32>
    %21 = tpu.matmul %20, %2, %cst_11 {dimension_numbers = #tpu.dot_dimension_numbers<[1], [0], [0], [1], [0, 0, 1, 1], [], []>} : vector<8x16xbf16>, vector<16x16xbf16>, vector<8x16xf32> -> vector<8x16xf32>
    %22 = arith.addf %19, %21 : vector<8x16xf32>
    %cst_12 = arith.constant 0.000000e+00 : f32
    %23 = vector.broadcast %cst_12 : f32 to vector<8x16xf32>
    %24 = arith.maximumf %22, %23 : vector<8x16xf32>
    %25 = vector.extract_strided_slice %11 {offsets = [16, 0], sizes = [8, 16], strides = [1, 1]} : vector<64x16xf32> to vector<8x16xf32>
    %26 = arith.truncf %24 : vector<8x16xf32> to vector<8x16xbf16>
    %cst_13 = arith.constant dense<0.000000e+00> : vector<8x16xf32>
    %27 = tpu.matmul %26, %2, %cst_13 {dimension_numbers = #tpu.dot_dimension_numbers<[1], [0], [0], [1], [0, 0, 1, 1], [], []>} : vector<8x16xbf16>, vector<16x16xbf16>, vector<8x16xf32> -> vector<8x16xf32>
    %28 = arith.addf %25, %27 : vector<8x16xf32>
    %cst_14 = arith.constant 0.000000e+00 : f32
    %29 = vector.broadcast %cst_14 : f32 to vector<8x16xf32>
    %30 = arith.maximumf %28, %29 : vector<8x16xf32>
    %31 = vector.extract_strided_slice %11 {offsets = [24, 0], sizes = [8, 16], strides = [1, 1]} : vector<64x16xf32> to vector<8x16xf32>
    %32 = arith.truncf %30 : vector<8x16xf32> to vector<8x16xbf16>
    %cst_15 = arith.constant dense<0.000000e+00> : vector<8x16xf32>
    %33 = tpu.matmul %32, %2, %cst_15 {dimension_numbers = #tpu.dot_dimension_numbers<[1], [0], [0], [1], [0, 0, 1, 1], [], []>} : vector<8x16xbf16>, vector<16x16xbf16>, vector<8x16xf32> -> vector<8x16xf32>
    %34 = arith.addf %31, %33 : vector<8x16xf32>
    %cst_16 = arith.constant 0.000000e+00 : f32
    %35 = vector.broadcast %cst_16 : f32 to vector<8x16xf32>
    %36 = arith.maximumf %34, %35 : vector<8x16xf32>
    %37 = vector.extract_strided_slice %11 {offsets = [32, 0], sizes = [8, 16], strides = [1, 1]} : vector<64x16xf32> to vector<8x16xf32>
    %38 = arith.truncf %36 : vector<8x16xf32> to vector<8x16xbf16>
    %cst_17 = arith.constant dense<0.000000e+00> : vector<8x16xf32>
    %39 = tpu.matmul %38, %2, %cst_17 {dimension_numbers = #tpu.dot_dimension_numbers<[1], [0], [0], [1], [0, 0, 1, 1], [], []>} : vector<8x16xbf16>, vector<16x16xbf16>, vector<8x16xf32> -> vector<8x16xf32>
    %40 = arith.addf %37, %39 : vector<8x16xf32>
    %cst_18 = arith.constant 0.000000e+00 : f32
    %41 = vector.broadcast %cst_18 : f32 to vector<8x16xf32>
    %42 = arith.maximumf %40, %41 : vector<8x16xf32>
    %43 = vector.extract_strided_slice %11 {offsets = [40, 0], sizes = [8, 16], strides = [1, 1]} : vector<64x16xf32> to vector<8x16xf32>
    %44 = arith.truncf %42 : vector<8x16xf32> to vector<8x16xbf16>
    %cst_19 = arith.constant dense<0.000000e+00> : vector<8x16xf32>
    %45 = tpu.matmul %44, %2, %cst_19 {dimension_numbers = #tpu.dot_dimension_numbers<[1], [0], [0], [1], [0, 0, 1, 1], [], []>} : vector<8x16xbf16>, vector<16x16xbf16>, vector<8x16xf32> -> vector<8x16xf32>
    %46 = arith.addf %43, %45 : vector<8x16xf32>
    %cst_20 = arith.constant 0.000000e+00 : f32
    %47 = vector.broadcast %cst_20 : f32 to vector<8x16xf32>
    %48 = arith.maximumf %46, %47 : vector<8x16xf32>
    %49 = vector.extract_strided_slice %11 {offsets = [48, 0], sizes = [8, 16], strides = [1, 1]} : vector<64x16xf32> to vector<8x16xf32>
    %50 = arith.truncf %48 : vector<8x16xf32> to vector<8x16xbf16>
    %cst_21 = arith.constant dense<0.000000e+00> : vector<8x16xf32>
    %51 = tpu.matmul %50, %2, %cst_21 {dimension_numbers = #tpu.dot_dimension_numbers<[1], [0], [0], [1], [0, 0, 1, 1], [], []>} : vector<8x16xbf16>, vector<16x16xbf16>, vector<8x16xf32> -> vector<8x16xf32>
    %52 = arith.addf %49, %51 : vector<8x16xf32>
    %cst_22 = arith.constant 0.000000e+00 : f32
    %53 = vector.broadcast %cst_22 : f32 to vector<8x16xf32>
    %54 = arith.maximumf %52, %53 : vector<8x16xf32>
    %55 = vector.extract_strided_slice %11 {offsets = [56, 0], sizes = [8, 16], strides = [1, 1]} : vector<64x16xf32> to vector<8x16xf32>
    %56 = arith.truncf %54 : vector<8x16xf32> to vector<8x16xbf16>
    %cst_23 = arith.constant dense<0.000000e+00> : vector<8x16xf32>
    %57 = tpu.matmul %56, %2, %cst_23 {dimension_numbers = #tpu.dot_dimension_numbers<[1], [0], [0], [1], [0, 0, 1, 1], [], []>} : vector<8x16xbf16>, vector<16x16xbf16>, vector<8x16xf32> -> vector<8x16xf32>
    %58 = arith.addf %55, %57 : vector<8x16xf32>
    %cst_24 = arith.constant 0.000000e+00 : f32
    %59 = vector.broadcast %cst_24 : f32 to vector<8x16xf32>
    %60 = arith.maximumf %58, %59 : vector<8x16xf32>
    %cst_25 = arith.constant dense<0.000000e+00> : vector<8x16xf32>
    %61 = tpu.matmul %60, %4, %cst_25 {dimension_numbers = #tpu.dot_dimension_numbers<[1], [0], [0], [1], [0, 0, 1, 1], [], []>} : vector<8x16xf32>, vector<16x16xf32>, vector<8x16xf32> -> vector<8x16xf32>
    %62 = vector.broadcast %7 : vector<1x16xf32> to vector<8x16xf32>
    %63 = arith.addf %61, %62 : vector<8x16xf32>
    %cst_26 = arith.constant 0.000000e+00 : f32
    %64 = vector.broadcast %cst_26 : f32 to vector<1x16xf32>
    %65 = vector.extract_strided_slice %63 {offsets = [0, 0], sizes = [1, 16], strides = [1, 1]} : vector<8x16xf32> to vector<1x16xf32>
    %66 = arith.truncf %64 : vector<1x16xf32> to vector<1x16xbf16>
    %cst_27 = arith.constant dense<0.000000e+00> : vector<1x16xf32>
    %67 = tpu.matmul %66, %6, %cst_27 {dimension_numbers = #tpu.dot_dimension_numbers<[1], [0], [0], [1], [0, 0, 1, 1], [], []>} : vector<1x16xbf16>, vector<16x16xbf16>, vector<1x16xf32> -> vector<1x16xf32>
    %68 = arith.addf %65, %67 : vector<1x16xf32>
    %cst_28 = arith.constant 0.000000e+00 : f32
    %69 = vector.broadcast %cst_28 : f32 to vector<1x16xf32>
    %70 = arith.maximumf %68, %69 : vector<1x16xf32>
    %71 = vector.extract_strided_slice %63 {offsets = [1, 0], sizes = [1, 16], strides = [1, 1]} : vector<8x16xf32> to vector<1x16xf32>
    %72 = arith.truncf %70 : vector<1x16xf32> to vector<1x16xbf16>
    %cst_29 = arith.constant dense<0.000000e+00> : vector<1x16xf32>
    %73 = tpu.matmul %72, %6, %cst_29 {dimension_numbers = #tpu.dot_dimension_numbers<[1], [0], [0], [1], [0, 0, 1, 1], [], []>} : vector<1x16xbf16>, vector<16x16xbf16>, vector<1x16xf32> -> vector<1x16xf32>
    %74 = arith.addf %71, %73 : vector<1x16xf32>
    %cst_30 = arith.constant 0.000000e+00 : f32
    %75 = vector.broadcast %cst_30 : f32 to vector<1x16xf32>
    %76 = arith.maximumf %74, %75 : vector<1x16xf32>
    %77 = vector.extract_strided_slice %63 {offsets = [2, 0], sizes = [1, 16], strides = [1, 1]} : vector<8x16xf32> to vector<1x16xf32>
    %78 = arith.truncf %76 : vector<1x16xf32> to vector<1x16xbf16>
    %cst_31 = arith.constant dense<0.000000e+00> : vector<1x16xf32>
    %79 = tpu.matmul %78, %6, %cst_31 {dimension_numbers = #tpu.dot_dimension_numbers<[1], [0], [0], [1], [0, 0, 1, 1], [], []>} : vector<1x16xbf16>, vector<16x16xbf16>, vector<1x16xf32> -> vector<1x16xf32>
    %80 = arith.addf %77, %79 : vector<1x16xf32>
    %cst_32 = arith.constant 0.000000e+00 : f32
    %81 = vector.broadcast %cst_32 : f32 to vector<1x16xf32>
    %82 = arith.maximumf %80, %81 : vector<1x16xf32>
    %83 = vector.extract_strided_slice %63 {offsets = [3, 0], sizes = [1, 16], strides = [1, 1]} : vector<8x16xf32> to vector<1x16xf32>
    %84 = arith.truncf %82 : vector<1x16xf32> to vector<1x16xbf16>
    %cst_33 = arith.constant dense<0.000000e+00> : vector<1x16xf32>
    %85 = tpu.matmul %84, %6, %cst_33 {dimension_numbers = #tpu.dot_dimension_numbers<[1], [0], [0], [1], [0, 0, 1, 1], [], []>} : vector<1x16xbf16>, vector<16x16xbf16>, vector<1x16xf32> -> vector<1x16xf32>
    %86 = arith.addf %83, %85 : vector<1x16xf32>
    %cst_34 = arith.constant 0.000000e+00 : f32
    %87 = vector.broadcast %cst_34 : f32 to vector<1x16xf32>
    %88 = arith.maximumf %86, %87 : vector<1x16xf32>
    %c0_35 = arith.constant 0 : index
    %c0_36 = arith.constant 0 : index
    %89 = vector.load %arg2[%c0_35, %c0_36] : memref<1x16xf32, #tpu.memory_space<vmem>>, vector<1x16xf32>
    tpu.vector_store %arg2[%c0_35, %c0_36], %88 {strides = array<i32>} : memref<1x16xf32, #tpu.memory_space<vmem>>, vector<1x16xf32>,
    return
  }
}

</mosaic_0001>

<bundles_post_ra>
// kernel: forward.1
= control target key start
LH: loop header
LB: loop body
LE: loop exit
PB: predicated region body
PF: predicated region fallthrough
CT: control target
= control target key end

     0   :  { %v1009_v3 = vmov 0.0   ;;  %vm39_vm0 = vcmask 261120   ;;  %vm1010_vm1 = vmmov 0   ;;  %s1172_s0 = inlined_call_operand.vmem [shape: f32[64,32], index: 0, kind: input, shape index: {}]   ;;  %s1173_s1 = inlined_call_operand.vmem [shape: f32[96,16], index: 1, kind: input, shape index: {}]   ;;  %s1174_s2 = inlined_call_operand.hbm [shape: f32[1,16], index: 2, kind: output, shape index: {}]  }
   0x1   :  { %v16_v0 = vld [vmem:[%s1173_s1 + $0x18] sm:$0xff]  ;;  %v15_v1 = vld [vmem:[%s1173_s1 + $0x10] sm:$0xff]  ;;  %v17_v2 = vld [vmem:[%s1173_s1 + $0x20] sm:$0xff]  ;;  %904 = vmatprep.subr.bf16.mxu1 %v1009_v3  ;;  %906 = vmatprep.mubr.msk.bf16.mxu1 %vm1010_vm1, %v1009_v3 }
   0x2   :  { %884 = vmatprep.subr.mxu0 %v16_v0  ;;  %v18_v4 = vld [vmem:[%s1173_s1 + $0x28] sm:$0xff]  ;;  %v27_v7 = vld [vmem:[%s1172_s0] sm:$0xff] }
   0x3   :  { %885 = vmatpush3.msra.mxu0 %v16_v0  ;;  %v1041_v5 = vpack.c.bf16 %v18_v4, %v17_v2  ;;  %v14_v6 = vld [vmem:[%s1173_s1 + $0x8] sm:$0xff] }
   0x4   :  { %7 = vsyncpa [#allocation3], 0  ;;  %886 = vmatprep.subr.mxu0 %v15_v1  ;;  %892 = vmatprep.mubr.msk.f32.mxu0 %vm39_vm0, %v27_v7  ;;  %v13_v8 = vld [vmem:[%s1173_s1] sm:$0xff]  ;;  %v28_v9 = vld [vmem:[%s1172_s0 + $0x8] sm:$0xff]  ;;  %v1011_v10 = vmov 0   ;;  %vm169_vm2 = vcmask 130048  }
   0x5   :  { %887 = vmatpush3.msra.mxu0 %v15_v1  ;;  %905 = vmatpush3.bf16.msra.mxu1 %v1041_v5  ;;  %v29_v11 = vld [vmem:[%s1172_s0 + $0x10] sm:$0xff]  ;;  %v30_v23 = vld [vmem:[%s1172_s0 + $0x18] sm:$0xff]  ;;  %v31_v24 = vld [vmem:[%s1172_s0 + $0x20] sm:$0xff]  ;;  %vm808_vm3 = vcmask 125955  }
   0x6   :  { %888 = vmatprep.subr.mxu0 %v14_v6  ;;  %910 = vmatprep.subr.bf16.mxu1 %v1009_v3  ;;  %v1076_v15 = vld [vmem:[%s1173_s1 + $0x30] ss:$0 sm:$0xff]  ;;  %v32_v25 = vld [vmem:[%s1172_s0 + $0x28] sm:$0xff]  ;;  %v34_v35 = vld [vmem:[%s1172_s0 + $0x38] sm:$0xff] }
   0x7   :  { %889 = vmatpush3.msra.mxu0 %v14_v6  ;;  %v33_v26 = vld [vmem:[%s1172_s0 + $0x30] sm:$0xff] }
   0x8   :  { %890 = vmatprep.subr.mxu0 %v13_v8  ;;  %907 = vmatmul.mubr.bf16.vlgmr.msra.gmra.mxu1 %v1011_v10 }
   0x9   :  { %891 = vmatpush3.msra.mxu0 %v13_v8  ;;  %911 = vmatpush3.bf16.msra.mxu1 %v1041_v5 }
   0xa   :  { %893 = vmatmul.mubr.msk.f32.vlgmr.msra.gmra.mxu0 %vm39_vm0, %v28_v9  ;;  %912 = vmatprep.mubr.msk.bf16.mxu1 %vm1010_vm1, %v1009_v3 }
   0xb   :  { %916 = vmatprep.subr.bf16.mxu1 %v1009_v3  ;;  %922 = vmatprep.subr.bf16.mxu0 %v1009_v3 }
   0xc   :  { %923 = vmatpush3.bf16.msra.mxu0 %v1041_v5  ;;  %895 = vmatprep.mubr.msk.f32.mxu0 %vm39_vm0, %v29_v11 }
   0xd   :  { %934 = vmatprep.subr.bf16.mxu0 %v1009_v3 }
   0xe   :  { %896 = vmatmul.mubr.msk.f32.gmra.mxu0 %vm39_vm0, %v30_v23 }
   0xf   :  { %898 = vmatprep.mubr.msk.f32.mxu0 %vm39_vm0, %v31_v24 }
  0x12   :  { %899 = vmatmul.mubr.msk.f32.gmra.mxu0 %vm39_vm0, %v32_v25  ;;  %v21_v25 = vld [vmem:[%s1173_s1 + $0x38] sm:$0xff] }
  0x13   :  { %901 = vmatprep.mubr.msk.f32.mxu0 %vm39_vm0, %v33_v26 }
  0x16   :  { %902 = vmatmul.mubr.msk.f32.gmra.mxu0 %vm39_vm0, %v34_v35 }
  0x17   :  { %924 = vmatprep.mubr.msk.bf16.mxu0 %vm1010_vm1, %v1009_v3 }
  0xc8   :  { %v207_v12 = vpop.f32.mrf.mxu1 }
  0xca   :  { %v894_v13 = vpop.f32.mrf.mxu0  ;;  %v908_v14 = vpop.f32.mrf.mxu1 }
  0xcb   :  { %v136_v27 = vadd.f32 %v894_v13, %v1076_v15 }
  0xcc   :  { %v130_v16 = vpop.f32.mrf.mxu0  ;;  %v210_v17 = vpop.f32.mrf.mxu1 }
  0xcd   :  { %v131_v18 = vadd.f32 %v1076_v15, %v130_v16  ;;  %v23_v17 = vld [vmem:[%s1173_s1 + $0x48] sm:$0xff] }
  0xce   :  { %v909_v19 = vpop.f32.mrf.mxu1  ;;  %v897_v36 = vpop.f32.mrf.mxu0 }
  0xcf   :  { %v213_v20 = vadd.f32 %v207_v12, %v131_v18  ;;  %v146_v50 = vadd.f32 %v897_v36, %v1076_v15  ;;  %v24_v18 = vld [vmem:[%s1173_s1 + $0x50] sm:$0xff] }
  0xd0   :  { %v140_v37 = vpop.f32.mrf.mxu0 }
  0xd1   :  { %v214_v21 = vmax.f32 %v213_v20, 0.0  ;;  %v141_v38 = vadd.f32 %v1076_v15, %v140_v37 }
  0xd2   :  { %v900_v46 = vpop.f32.mrf.mxu0 }
  0xd3   :  { %v215_v22 = vpack.c.bf16 %v214_v21, %v214_v21  ;;  %v156_v2 = vadd.f32 %v900_v46, %v1076_v15 }
  0xd4   :  { %v150_v47 = vpop.f32.mrf.mxu0 }
  0xd5   :  { %913 = vmatmul.mubr.msk.bf16.vlgmr.msra.gmra.mxu1 %vm169_vm2, %v215_v22  ;;  %v151_v58 = vadd.f32 %v1076_v15, %v150_v47  ;;  %v25_v22 = vpack.c.bf16 %v24_v18, %v23_v17 }
  0xd6   :  { %917 = vmatpush3.bf16.msra.mxu1 %v1041_v5  ;;  %918 = vmatprep.mubr.msk.bf16.mxu1 %vm1010_vm1, %v1009_v3  ;;  %v903_v48 = vpop.f32.mrf.mxu0 }
  0xd7   :  { %928 = vmatprep.subr.bf16.mxu1 %v1009_v3  ;;  %v166_v26 = vadd.f32 %v903_v48, %v1076_v15 }
  0xd8   :  { %v160_v49 = vpop.f32.mrf.mxu0 }
  0xd9   :  { %v161_v13 = vadd.f32 %v1076_v15, %v160_v49  ;;  %v840_v15 = vld [vmem:[%s1173_s1 + $0x58] ss:$0 sm:$0xff] }
 0x195   :  { %v253_v28 = vpop.f32.mrf.mxu1 }
 0x196   :  { %v259_v29 = vadd.f32 %v253_v28, %v136_v27 }
 0x197   :  { %v914_v30 = vpop.f32.mrf.mxu1 }
 0x198   :  { %v260_v31 = vmax.f32 %v259_v29, 0.0 }
 0x199   :  { %v256_v32 = vpop.f32.mrf.mxu1 }
 0x19a   :  { %v261_v33 = vpack.c.bf16 %v260_v31, %v260_v31 }
 0x19b   :  { %v915_v34 = vpop.f32.mrf.mxu1 }
 0x19c   :  { %919 = vmatmul.mubr.msk.bf16.vlgmr.msra.gmra.mxu1 %vm169_vm2, %v261_v33 }
 0x19d   :  { %929 = vmatpush3.bf16.msra.mxu1 %v1041_v5  ;;  %930 = vmatprep.mubr.msk.bf16.mxu1 %vm1010_vm1, %v1009_v3 }
 0x19e   :  { %940 = vmatprep.subr.bf16.mxu1 %v1009_v3 }
 0x25c   :  { %v299_v39 = vpop.f32.mrf.mxu1 }
 0x25d   :  { %v305_v40 = vadd.f32 %v299_v39, %v141_v38 }
 0x25e   :  { %v920_v41 = vpop.f32.mrf.mxu1 }
 0x25f   :  { %v306_v42 = vmax.f32 %v305_v40, 0.0 }
 0x260   :  { %v302_v43 = vpop.f32.mrf.mxu1 }
 0x261   :  { %v307_v44 = vpack.c.bf16 %v306_v42, %v306_v42 }
 0x262   :  { %v921_v45 = vpop.f32.mrf.mxu1 }
 0x263   :  { %925 = vmatmul.mubr.msk.bf16.vlgmr.msra.gmra.mxu0 %vm169_vm2, %v307_v44 }
 0x264   :  { %935 = vmatpush3.bf16.msra.mxu0 %v1041_v5  ;;  %936 = vmatprep.mubr.msk.bf16.mxu0 %vm1010_vm1, %v1009_v3 }
 0x265   :  { %946 = vmatprep.subr.bf16.mxu0 %v1009_v3 }
 0x323   :  { %v345_v51 = vpop.f32.mrf.mxu0 }
 0x324   :  { %v351_v52 = vadd.f32 %v345_v51, %v146_v50 }
 0x325   :  { %v926_v53 = vpop.f32.mrf.mxu0 }
 0x326   :  { %v352_v54 = vmax.f32 %v351_v52, 0.0 }
 0x327   :  { %v348_v55 = vpop.f32.mrf.mxu0 }
 0x328   :  { %v353_v56 = vpack.c.bf16 %v352_v54, %v352_v54 }
 0x329   :  { %v927_v57 = vpop.f32.mrf.mxu0 }
 0x32a   :  { %931 = vmatmul.mubr.msk.bf16.vlgmr.msra.gmra.mxu1 %vm169_vm2, %v353_v56 }
 0x32b   :  { %941 = vmatpush3.bf16.msra.mxu1 %v1041_v5  ;;  %942 = vmatprep.mubr.msk.bf16.mxu1 %vm1010_vm1, %v1009_v3 }
 0x32c   :  { %952 = vmatprep.subr.mxu1 %v1009_v3 }
 0x3ea   :  { %v391_v59 = vpop.f32.mrf.mxu1 }
 0x3eb   :  { %v397_v60 = vadd.f32 %v391_v59, %v151_v58 }
 0x3ec   :  { %v932_v61 = vpop.f32.mrf.mxu1 }
 0x3ed   :  { %v398_v62 = vmax.f32 %v397_v60, 0.0 }
 0x3ee   :  { %v394_v63 = vpop.f32.mrf.mxu1 }
 0x3ef   :  { %v399_v0 = vpack.c.bf16 %v398_v62, %v398_v62 }
 0x3f0   :  { %v933_v1 = vpop.f32.mrf.mxu1 }
 0x3f1   :  { %937 = vmatmul.mubr.msk.bf16.vlgmr.msra.gmra.mxu0 %vm169_vm2, %v399_v0 }
 0x3f2   :  { %947 = vmatpush3.bf16.msra.mxu0 %v1041_v5  ;;  %948 = vmatprep.mubr.msk.bf16.mxu0 %vm1010_vm1, %v1009_v3  ;;  %v22_v5 = vld [vmem:[%s1173_s1 + $0x40] sm:$0xff]  ;;  %s1012_s1 = smov [#allocation2]  }
 0x3f3   :  { %959 = vmatprep.subr.bf16.mxu0 %v1009_v3  ;;  %s816_s20 = sshll.u32 %s1012_s1, 4  ;;  %s817_s20 = int_to_ptr.vmem [resolvable:$true] %s816_s20 }
 0x3f4   :  { %s987_s21 = scalar_lea.vmem %s817_s20, 16  ;;  %s991_s22 = scalar_lea.vmem %s817_s20, 32 }
 0x3f5   :  { %p988_p0 = scmp.ne.s32.totalorder %s817_s20, %s987_s21  ;;  %p992_p1 = scmp.lt.s32.totalorder %s817_s20, %s817_s20 }
 0x3f6   :  { %p993_p2 = scmp.lt.s32.totalorder %s991_s22, %s987_s21 }
 0x3f8   :  { %p994_p3 = por %p993_p2, %p992_p1 }
 0x3fa   :  { %p995_p4 = pnand %p994_p3, %p988_p0 }
 0x4b1   :  { %v437_v4 = vpop.f32.mrf.mxu0 }
 0x4b2   :  { %v443_v6 = vadd.f32 %v437_v4, %v156_v2 }
 0x4b3   :  { %v938_v7 = vpop.f32.mrf.mxu0 }
 0x4b4   :  { %v444_v8 = vmax.f32 %v443_v6, 0.0 }
 0x4b5   :  { %v440_v9 = vpop.f32.mrf.mxu0 }
 0x4b6   :  { %v445_v11 = vpack.c.bf16 %v444_v8, %v444_v8 }
 0x4b7   :  { %v939_v12 = vpop.f32.mrf.mxu0 }
 0x4b8   :  { %943 = vmatmul.mubr.msk.bf16.vlgmr.msra.gmra.mxu1 %vm169_vm2, %v445_v11 }
 0x4b9   :  { %956 = vmatprep.mubr.msk.f32.mxu1 %vm1010_vm1, %v1009_v3  ;;  %953 = vmatpush3.msra.mxu1 %v22_v5 }
 0x4ba   :  { %954 = vmatprep.subr.mxu1 %v1009_v3 }
 0x4bb   :  { %955 = vmatpush3.msra.mxu1 %v21_v25 }
 0x4bc   :  { %965 = vmatprep.subr.bf16.mxu1 %v1009_v3 }
 0x578   :  { %v483_v14 = vpop.f32.mrf.mxu1 }
 0x579   :  { %v489_v16 = vadd.f32 %v483_v14, %v161_v13 }
 0x57a   :  { %v944_v19 = vpop.f32.mrf.mxu1 }
 0x57b   :  { %v490_v20 = vmax.f32 %v489_v16, 0.0 }
 0x57c   :  { %v486_v21 = vpop.f32.mrf.mxu1 }
 0x57d   :  { %v491_v23 = vpack.c.bf16 %v490_v20, %v490_v20 }
 0x57e   :  { %v945_v24 = vpop.f32.mrf.mxu1 }
 0x57f   :  { %949 = vmatmul.mubr.msk.bf16.vlgmr.msra.gmra.mxu0 %vm169_vm2, %v491_v23 }
 0x580   :  { %960 = vmatpush3.bf16.msra.mxu0 %v25_v22  ;;  %961 = vmatprep.mubr.msk.bf16.mxu0 %vm1010_vm1, %v1009_v3 }
 0x581   :  { %971 = vmatprep.subr.bf16.mxu0 %v1009_v3 }
 0x587   :  { %962 = vmatmul.mubr.bf16.vlgmr.msra.gmra.mxu0 %v1011_v10 }
 0x588   :  { %972 = vmatpush3.bf16.msra.mxu0 %v25_v22  ;;  %973 = vmatprep.mubr.msk.bf16.mxu0 %vm1010_vm1, %v1009_v3 }
 0x63f   :  { %v529_v27 = vpop.f32.mrf.mxu0 }
 0x640   :  { %v535_v28 = vadd.f32 %v529_v27, %v166_v26 }
 0x641   :  { %v950_v29 = vpop.f32.mrf.mxu0 }
 0x642   :  { %v536_v30 = vmax.f32 %v535_v28, 0.0 }
 0x643   :  { %v532_v31 = vpop.f32.mrf.mxu0 }
 0x644   :  { %957 = vmatmul.mubr.msk.f32.vlgmr.msra.gmra.mxu1 %vm169_vm2, %v536_v30 }
 0x645   :  { %v951_v10 = vpop.f32.mrf.mxu0  ;;  %966 = vmatpush3.bf16.msra.mxu1 %v25_v22  ;;  %967 = vmatprep.mubr.msk.bf16.mxu1 %vm1010_vm1, %v1009_v3 }
 0x646   :  { %977 = vmatprep.subr.bf16.mxu1 %v1009_v3 }
 0x647   :  { %v648_v32 = vpop.f32.mrf.mxu0 }
 0x649   :  { %v963_v33 = vpop.f32.mrf.mxu0 }
 0x64b   :  { %v651_v34 = vpop.f32.mrf.mxu0 }
 0x64d   :  { %v964_v35 = vpop.f32.mrf.mxu0 }
 0x704   :  { %v610_v36 = vpop.f32.mrf.mxu1 }
 0x705   :  { %v611_v37 = vadd.f32 %v840_v15, %v610_v36 }
 0x706   :  { %v958_v38 = vpop.f32.mrf.mxu1 }
 0x707   :  { %v654_v39 = vadd.f32 %v648_v32, %v611_v37 }
 0x709   :  { %v655_v40 = vmax.f32 %v654_v39, 0.0 }
 0x70b   :  { %v656_v41 = vpack.c.bf16 %v655_v40, %v655_v40 }
 0x70d   :  { %968 = vmatmul.mubr.msk.bf16.vlgmr.msra.gmra.mxu1 %vm169_vm2, %v656_v41 }
 0x70e   :  { %978 = vmatpush3.bf16.msra.mxu1 %v25_v22  ;;  %979 = vmatprep.mubr.msk.bf16.mxu1 %vm1010_vm1, %v1009_v3 }
 0x7cd   :  { %v694_v42 = vpop.f32.mrf.mxu1 }
 0x7ce   :  { %v701_v43 = vrot.slane %v694_v42, 7 }
 0x7cf   :  { %v969_v44 = vpop.f32.mrf.mxu1 }
 0x7d0   :  { %v703_v45 = vadd.f32 %v701_v43, %v611_v37 }
 0x7d1   :  { %v697_v46 = vpop.f32.mrf.mxu1 }
 0x7d2   :  { %v704_v47 = vmax.f32 %v703_v45, 0.0 }
 0x7d3   :  { %v970_v48 = vpop.f32.mrf.mxu1 }
 0x7d4   :  { %v705_v49 = vpack.c.bf16 %v704_v47, %v704_v47 }
 0x7d6   :  { %v707_v50 = vshrl.u32 %v705_v49, 16 }
 0x7d8   :  { %974 = vmatmul.mubr.msk.bf16.vlgmr.msra.gmra.mxu0 %vm169_vm2, %v707_v50 }
 0x898   :  { %v746_v51 = vpop.f32.mrf.mxu0 }
 0x899   :  { %v753_v52 = vrot.slane %v746_v51, 6 }
 0x89a   :  { %v975_v53 = vpop.f32.mrf.mxu0 }
 0x89b   :  { %v755_v54 = vadd.f32 %v753_v52, %v611_v37 }
 0x89c   :  { %v749_v55 = vpop.f32.mrf.mxu0 }
 0x89d   :  { %v756_v56 = vmax.f32 %v755_v54, 0.0 }
 0x89e   :  { %v976_v57 = vpop.f32.mrf.mxu0 }
 0x89f   :  { %v757_v58 = vpack.c.bf16 %v756_v56, %v756_v56 }
 0x8a1   :  { %v759_v3 = vrot.slane %v757_v58, 1 }
 0x8a3   :  { %980 = vmatmul.mubr.msk.bf16.vlgmr.msra.gmra.mxu1 %vm169_vm2, %v759_v3 }
 0x963   :  { %v797_v59 = vpop.f32.mrf.mxu1 }
 0x964   :  { %v804_v60 = vrot.slane %v797_v59, 5 }
 0x965   :  { %v981_v61 = vpop.f32.mrf.mxu1 }
 0x966   :  { %v806_v62 = vadd.f32 %v804_v60, %v611_v37 }
 0x967   :  { %v800_v63 = vpop.f32.mrf.mxu1 }
 0x968   :  { %v807_v0 = vmax.f32 %v806_v62, 0.0 }
 0x969   :  { %v982_v1 = vpop.f32.mrf.mxu1 }
 0x96a   :  { %809 = vst.msk [vmem:[#allocation2 - $0x3] sm:$0x8] %vm808_vm3, %v807_v0 }
 0x96b   :  { %998 = shalt.err (!%p995_p4)
}
 0x96c   :  { %819 = dma.vmem_to_hbm [thread:$0]  %s817_s20, 16, %s1174_s2, [#allocation3]  }
 0x96d   :  { %1007 = dma.done.wait [#allocation3], 16  }
 0x96e   :  { %1008 = vsyncadd [#allocation3], 4294967280 }
 0x96f   :  { %823 = vsyncpa [#allocation3], 1 }

</bundles_post_ra>
